<compile_context>
chip_gen: v7x
topology: tpu7x:2x2x1
jax: 0.10.0
libtpu: 0.0.40
codegen_flags: <defaults>
</compile_context>

<pallas_src>
import functools

import numpy as np
import jax
import jax.numpy as jnp
from jax.experimental import pallas as pl
from jax.experimental.pallas import tpu as pltpu

VMEM = pl.BlockSpec(memory_space=pltpu.MemorySpace.VMEM)


def _hardswish(x):
    return x * jnp.clip(x + 3.0, 0.0, 6.0) * (1.0 / 6.0)


def _hardsigmoid(x):
    return jnp.clip(x + 3.0, 0.0, 6.0) * (1.0 / 6.0)


def _fold_bn(w, gamma, beta, mean, var, eps=1e-3):
    scale = gamma / jnp.sqrt(var + eps)
    return w * scale, beta - mean * scale


@functools.lru_cache(maxsize=None)
def _dw_gather_matrix(B, OH, OW, OH2, OW2):
    """0/1 matrix G of shape (9*B*OH2*OW2, B*OH*OW).

    Row t*M2 + d selects the stem-output pixel feeding depthwise tap t
    (t = kh*3 + kw) at flattened output position d = b*OH2*OW2 + i*OW2 + j.
    Out-of-bounds taps (the k=3,s=2,p=1 zero padding) are all-zero rows.
    """
    M = B * OH * OW
    M2 = B * OH2 * OW2
    G = np.zeros((9 * M2, M), np.float32)
    for t in range(9):
        kh, kw = t // 3, t % 3
        for b in range(B):
            for i in range(OH2):
                for j in range(OW2):
                    ih = 2 * i + kh - 1
                    iw = 2 * j + kw - 1
                    if 0 <= ih < OH and 0 <= iw < OW:
                        G[t * M2 + b * OH2 * OW2 + i * OW2 + j,
                          b * OH * OW + ih * OW + iw] = 1.0
    return G


@functools.lru_cache(maxsize=None)
def _pool_matrices(B, S2):
    """avg (B, B*S2): per-batch spatial mean.  exp (B*S2, B): per-batch broadcast."""
    avg = np.zeros((B, B * S2), np.float32)
    for b in range(B):
        avg[b, b * S2:(b + 1) * S2] = 1.0 / S2
    exp = np.ascontiguousarray((avg.T > 0).astype(np.float32))
    return avg, exp


# ---------------------------------------------------------------------------
# Single fused kernel: stem conv -> depthwise conv -> SE -> 1x1 projection.
# All intermediates stay in VMEM / vector registers.
# ---------------------------------------------------------------------------
def _encode1_kernel(p_ref, w0_ref, b0_ref, g_ref, w1b_ref, b1_ref,
                    avg_ref, exp_ref, wf1_ref, bf1_ref, wf2_ref, bf2_ref,
                    wp_ref, bp_ref, o_ref):
    f32 = jnp.float32
    M2 = o_ref.shape[0]                       # B * OH2 * OW2

    # --- stage 0: stem 3x3 s2 conv (im2col matmul) + folded BN + Hardswish ---
    y = jnp.dot(p_ref[...], w0_ref[...], preferred_element_type=f32) + b0_ref[...]
    y = _hardswish(y)                         # (B*OH*OW, C)

    # --- stage 1a: depthwise 3x3 s2 conv + folded BN + ReLU ---
    # Strided im2col + zero padding are encoded in the constant gather matrix G,
    # so this is one MXU matmul followed by a 9-tap broadcast MAC.
    taps = jnp.dot(g_ref[...], y, preferred_element_type=f32) * w1b_ref[...]  # (9*M2, C)
    acc = taps[0:M2, :]
    for t in range(1, 9):                     # static unroll, aligned 32-row slices
        acc = acc + taps[t * M2:(t + 1) * M2, :]
    dw = jnp.maximum(acc + b1_ref[...], 0.0)  # (M2, C)

    # --- stage 1b: Squeeze-Excite (per-batch avgpool -> fc1/ReLU -> fc2/Hardsigmoid) ---
    s = jnp.dot(avg_ref[...], dw, preferred_element_type=f32)                 # (B, C)
    h = jnp.maximum(
        jnp.dot(s, wf1_ref[...], preferred_element_type=f32) + bf1_ref[...], 0.0)
    gch = _hardsigmoid(
        jnp.dot(h, wf2_ref[...], preferred_element_type=f32) + bf2_ref[...])  # (B, C)
    gate = jnp.dot(exp_ref[...], gch, preferred_element_type=f32)             # (M2, C)

    # --- stage 1c: 1x1 projection + folded BN (single flattened dot, no batched einsum) ---
    o_ref[...] = jnp.dot(dw * gate, wp_ref[...],
                         preferred_element_type=f32) + bp_ref[...]


class Encode1:
    """JAX/Pallas re-implementation of encode1 (MobileNetV3-Small stem + first
    inverted residual), with deterministic synthetic parameters."""

    def __init__(self, key):
        ks = jax.random.split(key, 20)
        n = lambda k, shape, s: s * jax.random.normal(k, shape, dtype=jnp.float32)
        u = lambda k, shape: jax.random.uniform(k, shape, jnp.float32, 0.5, 1.5)
        C_in, C, Csq = 3, 16, 8

        # synthetic stand-ins for the pretrained torchvision weights
        w0 = n(ks[0], (3, 3, C_in, C), 0.2)
        g0, be0, m0, v0 = 1.0 + n(ks[1], (C,), 0.1), n(ks[2], (C,), 0.05), n(ks[3], (C,), 0.05), u(ks[4], (C,))
        w1 = n(ks[5], (3, 3, C), 0.2)
        g1, be1, m1, v1 = 1.0 + n(ks[6], (C,), 0.1), n(ks[7], (C,), 0.05), n(ks[8], (C,), 0.05), u(ks[9], (C,))
        wfc1, bfc1 = n(ks[10], (C, Csq), 0.2), n(ks[11], (Csq,), 0.05)
        wfc2, bfc2 = n(ks[12], (Csq, C), 0.2), n(ks[13], (C,), 0.05)
        w2 = n(ks[14], (C, C), 0.2)
        g2, be2, m2, v2 = 1.0 + n(ks[15], (C,), 0.1), n(ks[16], (C,), 0.05), n(ks[17], (C,), 0.05), u(ks[18], (C,))

        # BN folding + weight reshapes done ONCE here (not in the jitted forward).
        w0f, b0f = _fold_bn(w0, g0, be0, m0, v0)
        w1f, b1f = _fold_bn(w1, g1, be1, m1, v1)
        wpf, bpf = _fold_bn(w2, g2, be2, m2, v2)

        self.C = C
        self.w0 = w0f.reshape(9 * C_in, C)      # (27, 16) im2col stem weight
        self.b0 = b0f.reshape(1, C)
        self.w1 = w1f.reshape(9, C)             # (9, 16) depthwise taps (kh-major, kw-minor)
        self.b1 = b1f.reshape(1, C)
        self.wfc1, self.bfc1 = wfc1, bfc1.reshape(1, Csq)
        self.wfc2, self.bfc2 = wfc2, bfc2.reshape(1, C)
        self.wp, self.bp = wpf, bpf.reshape(1, C)

    @functools.partial(jax.jit, static_argnums=0)
    def __call__(self, x_nchw):
        B, C_in, H, W = x_nchw.shape
        C = self.C
        OH, OW = (H - 1) // 2 + 1, (W - 1) // 2 + 1        # stem output (k=3,s=2,p=1)
        OH2, OW2 = (OH - 1) // 2 + 1, (OW - 1) // 2 + 1    # depthwise output
        S2 = OH2 * OW2
        M2 = B * S2

        # NCHW -> NHWC, pad, and stem im2col as a last-axis concat (no 5-D stack/transpose).
        x = jnp.transpose(x_nchw, (0, 2, 3, 1))
        xp = jnp.pad(x, ((0, 0), (1, 1), (1, 1), (0, 0)))
        pats = [xp[:, kh:kh + 2 * OH:2, kw:kw + 2 * OW:2, :]
                for kh in range(3) for kw in range(3)]
        p = jnp.concatenate(pats, axis=-1).reshape(B * OH * OW, 9 * C_in)

        # Trace-time constants (folded by jit): depthwise gather, SE pool/broadcast,
        # and the depthwise tap weights pre-broadcast to the gathered-row layout.
        G = _dw_gather_matrix(B, OH, OW, OH2, OW2)          # (9*M2, B*OH*OW)
        avg, exp = _pool_matrices(B, S2)                    # (B, M2), (M2, B)
        w1_big = jnp.repeat(self.w1, M2, axis=0)            # (9*M2, C), tap-major

        out = pl.pallas_call(
            _encode1_kernel,
            out_shape=jax.ShapeDtypeStruct((M2, C), jnp.float32),
            in_specs=[VMEM] * 14,
            out_specs=VMEM,
        )(p, self.w0, self.b0, G, w1_big, self.b1, avg, exp,
          self.wfc1, self.bfc1, self.wfc2, self.bfc2, self.wp, self.bp)

        y = out.reshape(B, OH2, OW2, C)
        return jnp.transpose(y, (0, 3, 1, 2))               # NHWC -> NCHW


if __name__ == "__main__":
    key = jax.random.PRNGKey(0)
    k_x, k_p = jax.random.split(key)
    x = jax.random.normal(k_x, (2, 3, 16, 16), dtype=jnp.float32)   # NCHW like PyTorch
    model = Encode1(k_p)
    out = jax.block_until_ready(model(x))
    assert out.shape == (2, 16, 4, 4), out.shape
    assert jnp.all(jnp.isfinite(out))
    print("KERNEL_OK")
</pallas_src>

<mosaic_0001>
module attributes {stable_mosaic.version = 11 : i64} {
  func.func @_encode1_kernel(%arg0: memref<128x27xf32, #tpu.memory_space<vmem>>, %arg1: memref<27x16xf32, #tpu.memory_space<vmem>>, %arg2: memref<1x16xf32, #tpu.memory_space<vmem>>, %arg3: memref<288x128xf32, #tpu.memory_space<vmem>>, %arg4: memref<288x16xf32, #tpu.memory_space<vmem>>, %arg5: memref<1x16xf32, #tpu.memory_space<vmem>>, %arg6: memref<2x32xf32, #tpu.memory_space<vmem>>, %arg7: memref<32x2xf32, #tpu.memory_space<vmem>>, %arg8: memref<16x8xf32, #tpu.memory_space<vmem>>, %arg9: memref<1x8xf32, #tpu.memory_space<vmem>>, %arg10: memref<8x16xf32, #tpu.memory_space<vmem>>, %arg11: memref<1x16xf32, #tpu.memory_space<vmem>>, %arg12: memref<16x16xf32, #tpu.memory_space<vmem>>, %arg13: memref<1x16xf32, #tpu.memory_space<vmem>>, %arg14: memref<32x16xf32, #tpu.memory_space<vmem>>) attributes {dimension_semantics = [], scalar_prefetch = 0 : i64, scratch_operands = 0 : i64, tpu.core_type = #tpu.core_type<tc>} {
    %c0 = arith.constant 0 : index
    %c0_0 = arith.constant 0 : index
    %0 = vector.load %arg0[%c0, %c0_0] : memref<128x27xf32, #tpu.memory_space<vmem>>, vector<128x27xf32>
    %c0_1 = arith.constant 0 : index
    %c0_2 = arith.constant 0 : index
    %1 = vector.load %arg1[%c0_1, %c0_2] : memref<27x16xf32, #tpu.memory_space<vmem>>, vector<27x16xf32>
    %cst = arith.constant dense<0.000000e+00> : vector<128x16xf32>
    %2 = tpu.matmul %0, %1, %cst {dimension_numbers = #tpu.dot_dimension_numbers<[1], [0], [0], [1], [0, 0, 1, 1], [], []>} : vector<128x27xf32>, vector<27x16xf32>, vector<128x16xf32> -> vector<128x16xf32>
    %c0_3 = arith.constant 0 : index
    %c0_4 = arith.constant 0 : index
    %3 = vector.load %arg2[%c0_3, %c0_4] : memref<1x16xf32, #tpu.memory_space<vmem>>, vector<1x16xf32>
    %4 = vector.broadcast %3 : vector<1x16xf32> to vector<128x16xf32>
    %5 = arith.addf %2, %4 : vector<128x16xf32>
    %cst_5 = arith.constant 3.000000e+00 : f32
    %6 = vector.broadcast %cst_5 : f32 to vector<128x16xf32>
    %7 = arith.addf %5, %6 : vector<128x16xf32>
    %cst_6 = arith.constant 0.000000e+00 : f32
    %cst_7 = arith.constant 6.000000e+00 : f32
    %8 = vector.broadcast %cst_6 : f32 to vector<128x16xf32>
    %9 = arith.maximumf %8, %7 : vector<128x16xf32>
    %10 = vector.broadcast %cst_7 : f32 to vector<128x16xf32>
    %11 = arith.minimumf %10, %9 : vector<128x16xf32>
    %12 = arith.mulf %5, %11 : vector<128x16xf32>
    %cst_8 = arith.constant 0.166666672 : f32
    %13 = vector.broadcast %cst_8 : f32 to vector<128x16xf32>
    %14 = arith.mulf %12, %13 : vector<128x16xf32>
    %c0_9 = arith.constant 0 : index
    %c0_10 = arith.constant 0 : index
    %15 = vector.load %arg3[%c0_9, %c0_10] : memref<288x128xf32, #tpu.memory_space<vmem>>, vector<288x128xf32>
    %cst_11 = arith.constant dense<0.000000e+00> : vector<288x16xf32>
    %16 = tpu.matmul %15, %14, %cst_11 {dimension_numbers = #tpu.dot_dimension_numbers<[1], [0], [0], [1], [0, 0, 1, 1], [], []>} : vector<288x128xf32>, vector<128x16xf32>, vector<288x16xf32> -> vector<288x16xf32>
    %c0_12 = arith.constant 0 : index
    %c0_13 = arith.constant 0 : index
    %17 = vector.load %arg4[%c0_12, %c0_13] : memref<288x16xf32, #tpu.memory_space<vmem>>, vector<288x16xf32>
    %18 = arith.mulf %16, %17 : vector<288x16xf32>
    %19 = vector.extract_strided_slice %18 {offsets = [0, 0], sizes = [32, 16], strides = [1, 1]} : vector<288x16xf32> to vector<32x16xf32>
    %20 = vector.extract_strided_slice %18 {offsets = [32, 0], sizes = [32, 16], strides = [1, 1]} : vector<288x16xf32> to vector<32x16xf32>
    %21 = arith.addf %19, %20 : vector<32x16xf32>
    %22 = vector.extract_strided_slice %18 {offsets = [64, 0], sizes = [32, 16], strides = [1, 1]} : vector<288x16xf32> to vector<32x16xf32>
    %23 = arith.addf %21, %22 : vector<32x16xf32>
    %24 = vector.extract_strided_slice %18 {offsets = [96, 0], sizes = [32, 16], strides = [1, 1]} : vector<288x16xf32> to vector<32x16xf32>
    %25 = arith.addf %23, %24 : vector<32x16xf32>
    %26 = vector.extract_strided_slice %18 {offsets = [128, 0], sizes = [32, 16], strides = [1, 1]} : vector<288x16xf32> to vector<32x16xf32>
    %27 = arith.addf %25, %26 : vector<32x16xf32>
    %28 = vector.extract_strided_slice %18 {offsets = [160, 0], sizes = [32, 16], strides = [1, 1]} : vector<288x16xf32> to vector<32x16xf32>
    %29 = arith.addf %27, %28 : vector<32x16xf32>
    %30 = vector.extract_strided_slice %18 {offsets = [192, 0], sizes = [32, 16], strides = [1, 1]} : vector<288x16xf32> to vector<32x16xf32>
    %31 = arith.addf %29, %30 : vector<32x16xf32>
    %32 = vector.extract_strided_slice %18 {offsets = [224, 0], sizes = [32, 16], strides = [1, 1]} : vector<288x16xf32> to vector<32x16xf32>
    %33 = arith.addf %31, %32 : vector<32x16xf32>
    %34 = vector.extract_strided_slice %18 {offsets = [256, 0], sizes = [32, 16], strides = [1, 1]} : vector<288x16xf32> to vector<32x16xf32>
    %35 = arith.addf %33, %34 : vector<32x16xf32>
    %c0_14 = arith.constant 0 : index
    %c0_15 = arith.constant 0 : index
    %36 = vector.load %arg5[%c0_14, %c0_15] : memref<1x16xf32, #tpu.memory_space<vmem>>, vector<1x16xf32>
    %37 = vector.broadcast %36 : vector<1x16xf32> to vector<32x16xf32>
    %38 = arith.addf %35, %37 : vector<32x16xf32>
    %cst_16 = arith.constant 0.000000e+00 : f32
    %39 = vector.broadcast %cst_16 : f32 to vector<32x16xf32>
    %40 = arith.maximumf %38, %39 : vector<32x16xf32>
    %c0_17 = arith.constant 0 : index
    %c0_18 = arith.constant 0 : index
    %41 = vector.load %arg6[%c0_17, %c0_18] : memref<2x32xf32, #tpu.memory_space<vmem>>, vector<2x32xf32>
    %cst_19 = arith.constant dense<0.000000e+00> : vector<2x16xf32>
    %42 = tpu.matmul %41, %40, %cst_19 {dimension_numbers = #tpu.dot_dimension_numbers<[1], [0], [0], [1], [0, 0, 1, 1], [], []>} : vector<2x32xf32>, vector<32x16xf32>, vector<2x16xf32> -> vector<2x16xf32>
    %c0_20 = arith.constant 0 : index
    %c0_21 = arith.constant 0 : index
    %43 = vector.load %arg8[%c0_20, %c0_21] : memref<16x8xf32, #tpu.memory_space<vmem>>, vector<16x8xf32>
    %cst_22 = arith.constant dense<0.000000e+00> : vector<2x8xf32>
    %44 = tpu.matmul %42, %43, %cst_22 {dimension_numbers = #tpu.dot_dimension_numbers<[1], [0], [0], [1], [0, 0, 1, 1], [], []>} : vector<2x16xf32>, vector<16x8xf32>, vector<2x8xf32> -> vector<2x8xf32>
    %c0_23 = arith.constant 0 : index
    %c0_24 = arith.constant 0 : index
    %45 = vector.load %arg9[%c0_23, %c0_24] : memref<1x8xf32, #tpu.memory_space<vmem>>, vector<1x8xf32>
    %46 = vector.broadcast %45 : vector<1x8xf32> to vector<2x8xf32>
    %47 = arith.addf %44, %46 : vector<2x8xf32>
    %cst_25 = arith.constant 0.000000e+00 : f32
    %48 = vector.broadcast %cst_25 : f32 to vector<2x8xf32>
    %49 = arith.maximumf %47, %48 : vector<2x8xf32>
    %c0_26 = arith.constant 0 : index
    %c0_27 = arith.constant 0 : index
    %50 = vector.load %arg10[%c0_26, %c0_27] : memref<8x16xf32, #tpu.memory_space<vmem>>, vector<8x16xf32>
    %cst_28 = arith.constant dense<0.000000e+00> : vector<2x16xf32>
    %51 = tpu.matmul %49, %50, %cst_28 {dimension_numbers = #tpu.dot_dimension_numbers<[1], [0], [0], [1], [0, 0, 1, 1], [], []>} : vector<2x8xf32>, vector<8x16xf32>, vector<2x16xf32> -> vector<2x16xf32>
    %c0_29 = arith.constant 0 : index
    %c0_30 = arith.constant 0 : index
    %52 = vector.load %arg11[%c0_29, %c0_30] : memref<1x16xf32, #tpu.memory_space<vmem>>, vector<1x16xf32>
    %53 = vector.broadcast %52 : vector<1x16xf32> to vector<2x16xf32>
    %54 = arith.addf %51, %53 : vector<2x16xf32>
    %cst_31 = arith.constant 3.000000e+00 : f32
    %55 = vector.broadcast %cst_31 : f32 to vector<2x16xf32>
    %56 = arith.addf %54, %55 : vector<2x16xf32>
    %cst_32 = arith.constant 0.000000e+00 : f32
    %cst_33 = arith.constant 6.000000e+00 : f32
    %57 = vector.broadcast %cst_32 : f32 to vector<2x16xf32>
    %58 = arith.maximumf %57, %56 : vector<2x16xf32>
    %59 = vector.broadcast %cst_33 : f32 to vector<2x16xf32>
    %60 = arith.minimumf %59, %58 : vector<2x16xf32>
    %cst_34 = arith.constant 0.166666672 : f32
    %61 = vector.broadcast %cst_34 : f32 to vector<2x16xf32>
    %62 = arith.mulf %60, %61 : vector<2x16xf32>
    %c0_35 = arith.constant 0 : index
    %c0_36 = arith.constant 0 : index
    %63 = vector.load %arg7[%c0_35, %c0_36] : memref<32x2xf32, #tpu.memory_space<vmem>>, vector<32x2xf32>
    %cst_37 = arith.constant dense<0.000000e+00> : vector<32x16xf32>
    %64 = tpu.matmul %63, %62, %cst_37 {dimension_numbers = #tpu.dot_dimension_numbers<[1], [0], [0], [1], [0, 0, 1, 1], [], []>} : vector<32x2xf32>, vector<2x16xf32>, vector<32x16xf32> -> vector<32x16xf32>
    %65 = arith.mulf %40, %64 : vector<32x16xf32>
    %c0_38 = arith.constant 0 : index
    %c0_39 = arith.constant 0 : index
    %66 = vector.load %arg12[%c0_38, %c0_39] : memref<16x16xf32, #tpu.memory_space<vmem>>, vector<16x16xf32>
    %cst_40 = arith.constant dense<0.000000e+00> : vector<32x16xf32>
    %67 = tpu.matmul %65, %66, %cst_40 {dimension_numbers = #tpu.dot_dimension_numbers<[1], [0], [0], [1], [0, 0, 1, 1], [], []>} : vector<32x16xf32>, vector<16x16xf32>, vector<32x16xf32> -> vector<32x16xf32>
    %c0_41 = arith.constant 0 : index
    %c0_42 = arith.constant 0 : index
    %68 = vector.load %arg13[%c0_41, %c0_42] : memref<1x16xf32, #tpu.memory_space<vmem>>, vector<1x16xf32>
    %69 = vector.broadcast %68 : vector<1x16xf32> to vector<32x16xf32>
    %70 = arith.addf %67, %69 : vector<32x16xf32>
    %c0_43 = arith.constant 0 : index
    %c0_44 = arith.constant 0 : index
    %71 = vector.load %arg14[%c0_43, %c0_44] : memref<32x16xf32, #tpu.memory_space<vmem>>, vector<32x16xf32>
    tpu.vector_store %arg14[%c0_43, %c0_44], %70 {strides = array<i32>} : memref<32x16xf32, #tpu.memory_space<vmem>>, vector<32x16xf32>,
    return
  }
}

</mosaic_0001>

<bundles_post_ra>
// kernel: a_call__.1
= control target key start
LH: loop header
LB: loop body
LE: loop exit
PB: predicated region body
PF: predicated region fallthrough
CT: control target
= control target key end

     0   :  { %vm124_vm0 = vcmask 1042432   ;;  %vm75_vm1 = vcmask 220160   ;;  %vm1622_vm2 = vmmov 1   ;;  %s2114_s0 = inlined_call_operand.vmem [shape: f32[128,27], index: 0, kind: input, shape index: {}]   ;;  %s2115_s1 = inlined_call_operand.vmem [shape: f32[27,16], index: 1, kind: input, shape index: {}]   ;;  %s2116_s2 = inlined_call_operand.vmem [shape: f32[1,16], index: 2, kind: input, shape index: {}]   ;;  %s2117_s3 = inlined_call_operand.vmem [shape: f32[288,128], index: 3, kind: input, shape index: {}]   ;;  %s2118_s4 = inlined_call_operand.vmem [shape: f32[288,16], index: 4, kind: input, shape index: {}]   ;;  %s2119_s5 = inlined_call_operand.vmem [shape: f32[1,16], index: 5, kind: input, shape index: {}]   ;;  %s2120_s6 = inlined_call_operand.vmem [shape: f32[2,32], index: 6, kind: input, shape index: {}]   ;;  %s2121_s7 = inlined_call_operand.vmem [shape: f32[32,2], index: 7, kind: input, shape index: {}]   ;;  %s2122_s8 = inlined_call_operand.vmem [shape: f32[16,8], index: 8, kind: input, shape index: {}]   ;;  %s2123_s9 = inlined_call_operand.vmem [shape: f32[1,8], index: 9, kind: input, shape index: {}]   ;;  %s2124_s10 = inlined_call_operand.vmem [shape: f32[8,16], index: 10, kind: input, shape index: {}]   ;;  %s2125_s11 = inlined_call_operand.vmem [shape: f32[1,16], index: 11, kind: input, shape index: {}]   ;;  %s2126_s12 = inlined_call_operand.vmem [shape: f32[16,16], index: 12, kind: input, shape index: {}]   ;;  %s2127_s13 = inlined_call_operand.vmem [shape: f32[1,16], index: 13, kind: input, shape index: {}]   ;;  %s2128_s14 = inlined_call_operand.hbm [shape: f32[32,16], index: 14, kind: output, shape index: {}]  }
   0x1   :  { %v64_v0 = vld [vmem:[%s2115_s1] sm:$0xff]  ;;  %v65_v1 = vld [vmem:[%s2115_s1 + $0x8] sm:$0xff]  ;;  %v66_v2 = vld [vmem:[%s2115_s1 + $0x10] sm:$0xff] }
   0x2   :  { %v1520_v3 = vpack.c.bf16 %v65_v1, %v64_v0  ;;  %v67_v4 = vld [vmem:[%s2115_s1 + $0x18] sm:$0x7]  ;;  %v48_v5 = vld [vmem:[%s2114_s0] sm:$0xff]  ;;  %vm1525_vm3 = vmpackc.low %vm124_vm0, %vm1622_vm2 }
   0x3   :  { %v1524_v6 = vpack.c.bf16 %v67_v4, %v66_v2  ;;  %1369 = vmatprep.mubr.msk.f32.mxu0 %vm75_vm1, %v48_v5 }
   0x4   :  { %1521 = vmatprep.subr.bf16.mxu0 %v1520_v3 }
   0x5   :  { %1523 = vmatpush3.bf16.msra.mxu0 %v1520_v3 }
   0x6   :  { %1526 = vmatprep.subr.msk.bf16.mxu0 %vm1525_vm3, %v1524_v6 }
   0x7   :  { %19 = vsyncpa [#allocation3], 0  ;;  %v49_v7 = vld [vmem:[%s2114_s0 + $0x8] sm:$0xff]  ;;  %v50_v8 = vld [vmem:[%s2114_s0 + $0x10] sm:$0xff]  ;;  %vm1624_vm4 = vmmov 0   ;;  %vm754_vm5 = vcmask 261120  }
   0x8   :  { %v51_v9 = vld [vmem:[%s2114_s0 + $0x18] sm:$0xff]  ;;  %v52_v10 = vld [vmem:[%s2114_s0 + $0x20] sm:$0xff]  ;;  %v53_v11 = vld [vmem:[%s2114_s0 + $0x28] sm:$0xff]  ;;  %vm837_vm6 = vcmask 130048   ;;  %vm920_vm7 = vcmask 64512   ;;  %vm1002_vm8 = vcmask 15360  }
   0x9   :  { %1529 = vmatpush3.bf16.msk.msra.mxu0 %vm1525_vm3, %v1524_v6  ;;  %v54_v12 = vld [vmem:[%s2114_s0 + $0x30] sm:$0xff]  ;;  %v55_v13 = vld [vmem:[%s2114_s0 + $0x38] sm:$0xff]  ;;  %v56_v14 = vld [vmem:[%s2114_s0 + $0x40] sm:$0xff]  ;;  %vm1015_vm9 = vcmask 1041408   ;;  %s1626_s25 = smov [#allocation2]  }
   0xa   :  { %v57_v15 = vld [vmem:[%s2114_s0 + $0x48] sm:$0xff]  ;;  %v58_v16 = vld [vmem:[%s2114_s0 + $0x50] sm:$0xff]  ;;  %v59_v17 = vld [vmem:[%s2114_s0 + $0x58] sm:$0xff]  ;;  %s1223_s1 = sshll.u32 %s1626_s25, 4  ;;  %s1224_s1 = int_to_ptr.vmem [resolvable:$true] %s1223_s1 }
   0xb   :  { %v60_v18 = vld [vmem:[%s2114_s0 + $0x60] sm:$0xff]  ;;  %v61_v19 = vld [vmem:[%s2114_s0 + $0x68] sm:$0xff]  ;;  %v62_v20 = vld [vmem:[%s2114_s0 + $0x70] sm:$0xff]  ;;  %p1603_p1 = scmp.lt.s32.totalorder %s1224_s1, %s1224_s1 }
   0xc   :  { %1370 = vmatmul.mubr.msk.f32.vlgmr.msra.gmra.mrb[0].mxu0 %vm75_vm1, %v49_v7  ;;  %v63_v21 = vld [vmem:[%s2114_s0 + $0x78] sm:$0xff]  ;;  %v353_v22 = vld [vmem:[%s2117_s3] sm:$0xff] }
   0xd   :  { %1372 = vmatprep.mubr.msk.f32.mxu0 %vm75_vm1, %v50_v8  ;;  %v361_v23 = vld [vmem:[%s2117_s3 + $0x40] sm:$0xff] }
   0xe   :  { %1437 = vmatprep.mubr.f32.mxu1 %v361_v23  ;;  %v1789_v24 = vld [vmem:[%s2116_s2] ss:$0 sm:$0xff] }
  0x10   :  { %1373 = vmatmul.mubr.msk.f32.gmra.mrb[2].mxu0 %vm75_vm1, %v51_v9 }
  0x11   :  { %1375 = vmatprep.mubr.msk.f32.mxu0 %vm75_vm1, %v52_v10 }
  0x14   :  { %1376 = vmatmul.mubr.msk.f32.gmra.mrb[4].mxu0 %vm75_vm1, %v53_v11 }
  0x15   :  { %1378 = vmatprep.mubr.msk.f32.mxu0 %vm75_vm1, %v54_v12 }
  0x18   :  { %1379 = vmatmul.mubr.msk.f32.gmra.mrb[6].mxu0 %vm75_vm1, %v55_v13 }
  0x19   :  { %1381 = vmatprep.mubr.msk.f32.mxu0 %vm75_vm1, %v56_v14 }
  0x1c   :  { %1382 = vmatmul.mubr.msk.f32.gmra.mrb[8].mxu0 %vm75_vm1, %v57_v15 }
  0x1d   :  { %1384 = vmatprep.mubr.msk.f32.mxu0 %vm75_vm1, %v58_v16 }
  0x20   :  { %1385 = vmatmul.mubr.msk.f32.gmra.mrb[10].mxu0 %vm75_vm1, %v59_v17 }
  0x21   :  { %1387 = vmatprep.mubr.msk.f32.mxu0 %vm75_vm1, %v60_v18 }
  0x24   :  { %1388 = vmatmul.mubr.msk.f32.gmra.mrb[12].mxu0 %vm75_vm1, %v61_v19 }
  0x25   :  { %1390 = vmatprep.mubr.msk.f32.mxu0 %vm75_vm1, %v62_v20 }
  0x28   :  { %1391 = vmatmul.mubr.msk.f32.gmra.mrb[14].mxu0 %vm75_vm1, %v63_v21 }
  0x29   :  { %1425 = vmatprep.mubr.f32.mxu0 %v353_v22 }
  0xdf   :  { %v1371_v25 = vpop.f32.mrb[0].mxu0 }
  0xe0   :  { %v200_v26 = vadd.f32 %v1371_v25, %v1789_v24  ;;  %v194_v27 = vpop.f32.mrb[1].mxu0 }
  0xe1   :  { %v195_v28 = vadd.f32 %v1789_v24, %v194_v27 }
  0xe2   :  { %v274_v29 = vadd.f32 3.0, %v200_v26 }
  0xe3   :  { %v273_v30 = vadd.f32 3.0, %v195_v28  ;;  %v1374_v31 = vpop.f32.mrb[2].mxu0 }
  0xe4   :  { %v290_v32 = vmax.f32 %v274_v29, 0.0  ;;  %v210_v33 = vadd.f32 %v1374_v31, %v1789_v24  ;;  %v204_v34 = vpop.f32.mrb[3].mxu0 }
  0xe5   :  { %v289_v35 = vmax.f32 %v273_v30, 0.0  ;;  %v205_v36 = vadd.f32 %v1789_v24, %v204_v34 }
  0xe6   :  { %v306_v37 = vmin.f32 %v290_v32, 6.0  ;;  %v276_v38 = vadd.f32 3.0, %v210_v33 }
  0xe7   :  { %v305_v39 = vmin.f32 %v289_v35, 6.0  ;;  %v275_v40 = vadd.f32 3.0, %v205_v36  ;;  %v1377_v41 = vpop.f32.mrb[4].mxu0 }
  0xe8   :  { %v322_v42 = vmul.f32 %v306_v37, %v200_v26  ;;  %v292_v43 = vmax.f32 %v276_v38, 0.0  ;;  %v220_v44 = vadd.f32 %v1377_v41, %v1789_v24  ;;  %v214_v45 = vpop.f32.mrb[5].mxu0 }
  0xe9   :  { %v321_v46 = vmul.f32 %v305_v39, %v195_v28  ;;  %v291_v47 = vmax.f32 %v275_v40, 0.0  ;;  %v215_v48 = vadd.f32 %v1789_v24, %v214_v45 }
  0xea   :  { %v338_v49 = vmul.f32 0.16666667, %v322_v42  ;;  %v308_v50 = vmin.f32 %v292_v43, 6.0  ;;  %v278_v51 = vadd.f32 3.0, %v220_v44 }
  0xeb   :  { %v337_v52 = vmul.f32 0.16666667, %v321_v46  ;;  %v307_v53 = vmin.f32 %v291_v47, 6.0  ;;  %v277_v54 = vadd.f32 3.0, %v215_v48  ;;  %v1380_v55 = vpop.f32.mrb[6].mxu0 }
  0xec   :  { %v324_v56 = vmul.f32 %v308_v50, %v210_v33  ;;  %v294_v57 = vmax.f32 %v278_v51, 0.0  ;;  %v230_v58 = vadd.f32 %v1380_v55, %v1789_v24  ;;  %v224_v59 = vpop.f32.mrb[7].mxu0 }
  0xed   :  { %v1530_v60 = vpack.c.bf16 %v338_v49, %v337_v52  ;;  %v323_v61 = vmul.f32 %v307_v53, %v205_v36  ;;  %v293_v62 = vmax.f32 %v277_v54, 0.0  ;;  %v225_v63 = vadd.f32 %v1789_v24, %v224_v59 }
  0xee   :  { %v340_v0 = vmul.f32 0.16666667, %v324_v56  ;;  %v310_v1 = vmin.f32 %v294_v57, 6.0  ;;  %v280_v2 = vadd.f32 3.0, %v230_v58 }
  0xef   :  { %v339_v3 = vmul.f32 0.16666667, %v323_v61  ;;  %v309_v4 = vmin.f32 %v293_v62, 6.0  ;;  %v279_v5 = vadd.f32 3.0, %v225_v63  ;;  %v1383_v6 = vpop.f32.mrb[8].mxu0  ;;  %1531 = vmatprep.subr.bf16.mxu0 %v1530_v60  ;;  %1575 = vmatprep.subr.bf16.mxu1 %v1530_v60 }
  0xf0   :  { %v326_v7 = vmul.f32 %v310_v1, %v220_v44  ;;  %v296_v8 = vmax.f32 %v280_v2, 0.0  ;;  %v240_v9 = vadd.f32 %v1383_v6, %v1789_v24  ;;  %v234_v10 = vpop.f32.mrb[9].mxu0  ;;  %1533 = vmatpush3.bf16.msra.mxu0 %v1530_v60  ;;  %1583 = vmatpush3.bf16.msra.mxu1 %v1530_v60 }
  0xf1   :  { %v1534_v11 = vpack.c.bf16 %v340_v0, %v339_v3  ;;  %v325_v12 = vmul.f32 %v309_v4, %v215_v48  ;;  %v295_v13 = vmax.f32 %v279_v5, 0.0  ;;  %v235_v14 = vadd.f32 %v1789_v24, %v234_v10 }
  0xf2   :  { %v342_v15 = vmul.f32 0.16666667, %v326_v7  ;;  %v312_v16 = vmin.f32 %v296_v8, 6.0  ;;  %v282_v17 = vadd.f32 3.0, %v240_v9 }
  0xf3   :  { %v341_v18 = vmul.f32 0.16666667, %v325_v12  ;;  %v311_v19 = vmin.f32 %v295_v13, 6.0  ;;  %v281_v20 = vadd.f32 3.0, %v235_v14  ;;  %v1386_v21 = vpop.f32.mrb[10].mxu0  ;;  %1535 = vmatprep.subr.bf16.mxu0 %v1534_v11  ;;  %1576 = vmatprep.subr.bf16.mxu1 %v1534_v11 }
  0xf4   :  { %v328_v22 = vmul.f32 %v312_v16, %v230_v58  ;;  %v298_v23 = vmax.f32 %v282_v17, 0.0  ;;  %v250_v25 = vadd.f32 %v1386_v21, %v1789_v24  ;;  %v244_v26 = vpop.f32.mrb[11].mxu0  ;;  %1537 = vmatpush3.bf16.msra.mxu0 %v1534_v11  ;;  %1584 = vmatpush3.bf16.msra.mxu1 %v1534_v11  ;;  %v354_v17 = vld [vmem:[%s2117_s3 + $0x8] sm:$0xff]  ;;  %v356_v21 = vld [vmem:[%s2117_s3 + $0x18] sm:$0xff] }
  0xf5   :  { %v1538_v27 = vpack.c.bf16 %v342_v15, %v341_v18  ;;  %v327_v28 = vmul.f32 %v311_v19, %v225_v63  ;;  %v297_v29 = vmax.f32 %v281_v20, 0.0  ;;  %v245_v30 = vadd.f32 %v1789_v24, %v244_v26  ;;  %v362_v18 = vld [vmem:[%s2117_s3 + $0x48] sm:$0xff]  ;;  %v355_v19 = vld [vmem:[%s2117_s3 + $0x10] sm:$0xff] }
  0xf6   :  { %v344_v31 = vmul.f32 0.16666667, %v328_v22  ;;  %v314_v32 = vmin.f32 %v298_v23, 6.0  ;;  %v284_v33 = vadd.f32 3.0, %v250_v25  ;;  %v363_v20 = vld [vmem:[%s2117_s3 + $0x50] sm:$0xff]  ;;  %v364_v22 = vld [vmem:[%s2117_s3 + $0x58] sm:$0xff] }
  0xf7   :  { %v343_v34 = vmul.f32 0.16666667, %v327_v28  ;;  %v313_v35 = vmin.f32 %v297_v29, 6.0  ;;  %v283_v36 = vadd.f32 3.0, %v245_v30  ;;  %v1389_v37 = vpop.f32.mrb[12].mxu0  ;;  %1539 = vmatprep.subr.bf16.mxu0 %v1538_v27  ;;  %1577 = vmatprep.subr.bf16.mxu1 %v1538_v27  ;;  %v357_v23 = vld [vmem:[%s2117_s3 + $0x20] sm:$0xff] }
  0xf8   :  { %v330_v38 = vmul.f32 %v314_v32, %v240_v9  ;;  %v300_v39 = vmax.f32 %v284_v33, 0.0  ;;  %v260_v40 = vadd.f32 %v1389_v37, %v1789_v24  ;;  %v254_v41 = vpop.f32.mrb[13].mxu0  ;;  %1541 = vmatpush3.bf16.msra.mxu0 %v1538_v27  ;;  %1585 = vmatpush3.bf16.msra.mxu1 %v1538_v27  ;;  %v358_v26 = vld [vmem:[%s2117_s3 + $0x28] sm:$0xff]  ;;  %v359_v28 = vld [vmem:[%s2117_s3 + $0x30] sm:$0xff]  ;;  %v369_v32 = vld [vmem:[%s2117_s3 + $0x80] sm:$0xff] }
  0xf9   :  { %v1542_v42 = vpack.c.bf16 %v344_v31, %v343_v34  ;;  %v329_v43 = vmul.f32 %v313_v35, %v235_v14  ;;  %v299_v44 = vmax.f32 %v283_v36, 0.0  ;;  %v255_v45 = vadd.f32 %v1789_v24, %v254_v41  ;;  %v366_v27 = vld [vmem:[%s2117_s3 + $0x68] sm:$0xff]  ;;  %v367_v29 = vld [vmem:[%s2117_s3 + $0x70] sm:$0xff]  ;;  %v368_v31 = vld [vmem:[%s2117_s3 + $0x78] sm:$0xff] }
  0xfa   :  { %v346_v46 = vmul.f32 0.16666667, %v330_v38  ;;  %v316_v47 = vmin.f32 %v300_v39, 6.0  ;;  %v286_v48 = vadd.f32 3.0, %v260_v40  ;;  %v370_v33 = vld [vmem:[%s2117_s3 + $0x88] sm:$0xff]  ;;  %v371_v34 = vld [vmem:[%s2117_s3 + $0x90] sm:$0xff] }
  0xfb   :  { %v345_v49 = vmul.f32 0.16666667, %v329_v43  ;;  %v315_v50 = vmin.f32 %v299_v44, 6.0  ;;  %v285_v51 = vadd.f32 3.0, %v255_v45  ;;  %v1392_v52 = vpop.f32.mrb[14].mxu0  ;;  %1543 = vmatprep.subr.bf16.mxu0 %v1542_v42  ;;  %1578 = vmatprep.subr.bf16.mxu1 %v1542_v42  ;;  %v372_v35 = vld [vmem:[%s2117_s3 + $0x98] sm:$0xff] }
  0xfc   :  { %v332_v53 = vmul.f32 %v316_v47, %v250_v25  ;;  %v302_v54 = vmax.f32 %v286_v48, 0.0  ;;  %v270_v55 = vadd.f32 %v1392_v52, %v1789_v24  ;;  %v264_v56 = vpop.f32.mrb[15].mxu0  ;;  %1545 = vmatpush3.bf16.msra.mxu0 %v1542_v42  ;;  %1586 = vmatpush3.bf16.msra.mxu1 %v1542_v42  ;;  %v365_v25 = vld [vmem:[%s2117_s3 + $0x60] sm:$0xff]  ;;  %v374_v37 = vld [vmem:[%s2117_s3 + $0xa8] sm:$0xff]  ;;  %v375_v38 = vld [vmem:[%s2117_s3 + $0xb0] sm:$0xff]  ;;  %v1623_v52 = vmov 0.0|0.0  }
  0xfd   :  { %v1546_v57 = vpack.c.bf16 %v346_v46, %v345_v49  ;;  %v331_v58 = vmul.f32 %v315_v50, %v245_v30  ;;  %v301_v59 = vmax.f32 %v285_v51, 0.0  ;;  %v265_v60 = vadd.f32 %v1789_v24, %v264_v56  ;;  %v360_v30 = vld [vmem:[%s2117_s3 + $0x38] sm:$0xff]  ;;  %v373_v36 = vld [vmem:[%s2117_s3 + $0xa0] sm:$0xff]  ;;  %v378_v41 = vld [vmem:[%s2117_s3 + $0xc8] sm:$0xff] }
  0xfe   :  { %v348_v61 = vmul.f32 0.16666667, %v332_v53  ;;  %v318_v62 = vmin.f32 %v302_v54, 6.0  ;;  %v288_v63 = vadd.f32 3.0, %v270_v55  ;;  %v376_v39 = vld [vmem:[%s2117_s3 + $0xb8] sm:$0xff]  ;;  %v379_v42 = vld [vmem:[%s2117_s3 + $0xd0] sm:$0xff] }
  0xff   :  { %v347_v0 = vmul.f32 0.16666667, %v331_v58  ;;  %v317_v1 = vmin.f32 %v301_v59, 6.0  ;;  %v287_v2 = vadd.f32 3.0, %v265_v60  ;;  %1547 = vmatprep.subr.bf16.mxu0 %v1546_v57  ;;  %1579 = vmatprep.subr.bf16.mxu1 %v1546_v57  ;;  %v380_v43 = vld [vmem:[%s2117_s3 + $0xd8] sm:$0xff]  ;;  %v381_v44 = vld [vmem:[%s2117_s3 + $0xe0] sm:$0xff] }
 0x100   :  { %v334_v3 = vmul.f32 %v318_v62, %v260_v40  ;;  %v304_v4 = vmax.f32 %v288_v63, 0.0  ;;  %1549 = vmatpush3.bf16.msra.mxu0 %v1546_v57  ;;  %1587 = vmatpush3.bf16.msra.mxu1 %v1546_v57  ;;  %v377_v40 = vld [vmem:[%s2117_s3 + $0xc0] sm:$0xff]  ;;  %v383_v46 = vld [vmem:[%s2117_s3 + $0xf0] sm:$0xff]  ;;  %v384_v47 = vld [vmem:[%s2117_s3 + $0xf8] sm:$0xff]  ;;  %v1625_v53 = vmov 0.0  }
 0x101   :  { %v1550_v5 = vpack.c.bf16 %v348_v61, %v347_v0  ;;  %v333_v6 = vmul.f32 %v317_v1, %v255_v45  ;;  %v303_v7 = vmax.f32 %v287_v2, 0.0  ;;  %v382_v45 = vld [vmem:[%s2117_s3 + $0xe8] sm:$0xff]  ;;  %v385_v48 = vld [vmem:[%s2117_s3 + $0x100] sm:$0xff]  ;;  %v387_v50 = vld [vmem:[%s2117_s3 + $0x110] sm:$0xff] }
 0x102   :  { %v350_v8 = vmul.f32 0.16666667, %v334_v3  ;;  %v320_v9 = vmin.f32 %v304_v4, 6.0  ;;  %v386_v49 = vld [vmem:[%s2117_s3 + $0x108] sm:$0xff]  ;;  %v388_v51 = vld [vmem:[%s2117_s3 + $0x118] sm:$0xff]  ;;  %v634_v61 = vld [vmem:[%s2118_s4] sm:$0xff] }
 0x103   :  { %v349_v10 = vmul.f32 0.16666667, %v333_v6  ;;  %v319_v11 = vmin.f32 %v303_v7, 6.0  ;;  %1551 = vmatprep.subr.bf16.mxu0 %v1550_v5  ;;  %1580 = vmatprep.subr.bf16.mxu1 %v1550_v5  ;;  %v635_v58 = vld [vmem:[%s2118_s4 + $0x8] sm:$0xff]  ;;  %v638_v2 = vld [vmem:[%s2118_s4 + $0x20] sm:$0xff] }
 0x104   :  { %v336_v24 = vmul.f32 %v320_v9, %v270_v55  ;;  %1553 = vmatpush3.bf16.msra.mxu0 %v1550_v5  ;;  %1588 = vmatpush3.bf16.msra.mxu1 %v1550_v5  ;;  %v639_v0 = vld [vmem:[%s2118_s4 + $0x28] sm:$0xff]  ;;  %v637_v5 = vld [vmem:[%s2118_s4 + $0x18] sm:$0xff]  ;;  %v636_v9 = vld [vmem:[%s2118_s4 + $0x10] sm:$0xff] }
 0x105   :  { %v1554_v12 = vpack.c.bf16 %v350_v8, %v349_v10  ;;  %v335_v13 = vmul.f32 %v319_v11, %v265_v60  ;;  %v643_v3 = vld [vmem:[%s2118_s4 + $0x48] sm:$0xff]  ;;  %v642_v8 = vld [vmem:[%s2118_s4 + $0x40] sm:$0xff] }
 0x106   :  { %v352_v14 = vmul.f32 0.16666667, %v336_v24 }
 0x107   :  { %v351_v15 = vmul.f32 0.16666667, %v335_v13  ;;  %1555 = vmatprep.subr.bf16.mxu0 %v1554_v12  ;;  %1581 = vmatprep.subr.bf16.mxu1 %v1554_v12 }
 0x108   :  { %1557 = vmatpush3.bf16.msra.mxu0 %v1554_v12  ;;  %1589 = vmatpush3.bf16.msra.mxu1 %v1554_v12  ;;  %v647_v12 = vld [vmem:[%s2118_s4 + $0x68] sm:$0xff] }
 0x109   :  { %v1558_v16 = vpack.c.bf16 %v352_v14, %v351_v15  ;;  %v641_v14 = vld [vmem:[%s2118_s4 + $0x38] sm:$0xff] }
 0x10b   :  { %1559 = vmatprep.subr.bf16.mxu0 %v1558_v16  ;;  %1582 = vmatprep.subr.bf16.mxu1 %v1558_v16 }
 0x10c   :  { %1561 = vmatpush3.bf16.msra.mxu0 %v1558_v16  ;;  %1590 = vmatpush3.bf16.msra.mxu1 %v1558_v16 }
 0x10d   :  { %1562 = vmatprep.subr.bf16.mxu0 %v1623_v52 }
 0x10f   :  { %1426 = vmatmul.mubr.f32.vlgmr.msra.gmra.mrb[16].mxu0 %v354_v17  ;;  %1438 = vmatmul.mubr.f32.vlgmr.msra.gmra.mrb[0].mxu1 %v362_v18  ;;  %v646_v18 = vld [vmem:[%s2118_s4 + $0x60] sm:$0xff] }
 0x110   :  { %1428 = vmatprep.mubr.f32.mxu0 %v355_v19  ;;  %1440 = vmatprep.mubr.f32.mxu1 %v363_v20  ;;  %v640_v19 = vld [vmem:[%s2118_s4 + $0x30] sm:$0xff] }
 0x113   :  { %1429 = vmatmul.mubr.f32.gmra.mrb[18].mxu0 %v356_v21  ;;  %1441 = vmatmul.mubr.f32.gmra.mrb[2].mxu1 %v364_v22  ;;  %v645_v21 = vld [vmem:[%s2118_s4 + $0x58] sm:$0xff] }
 0x114   :  { %1431 = vmatprep.mubr.f32.mxu0 %v357_v23  ;;  %1443 = vmatprep.mubr.f32.mxu1 %v365_v25 }
 0x117   :  { %1432 = vmatmul.mubr.f32.gmra.mrb[20].mxu0 %v358_v26  ;;  %1444 = vmatmul.mubr.f32.gmra.mrb[4].mxu1 %v366_v27  ;;  %v644_v27 = vld [vmem:[%s2118_s4 + $0x50] sm:$0xff] }
 0x118   :  { %1434 = vmatprep.mubr.f32.mxu0 %v359_v28  ;;  %1446 = vmatprep.mubr.f32.mxu1 %v367_v29 }
 0x11b   :  { %1435 = vmatmul.mubr.f32.gmra.mrb[22].mxu0 %v360_v30  ;;  %1447 = vmatmul.mubr.f32.gmra.mrb[6].mxu1 %v368_v31 }
 0x11c   :  { %1449 = vmatprep.mubr.f32.mxu1 %v369_v32  ;;  %1487 = vmatprep.mubr.msk.f32.mxu0 %vm1624_vm4, %v1625_v53 }
 0x11f   :  { %1450 = vmatmul.mubr.f32.gmra.mrb[8].mxu1 %v370_v33 }
 0x120   :  { %1452 = vmatprep.mubr.f32.mxu1 %v371_v34 }
 0x123   :  { %1453 = vmatmul.mubr.f32.gmra.mrb[10].mxu1 %v372_v35  ;;  %v649_v35 = vld [vmem:[%s2118_s4 + $0x78] sm:$0xff] }
 0x124   :  { %1455 = vmatprep.mubr.f32.mxu1 %v373_v36 }
 0x127   :  { %1456 = vmatmul.mubr.f32.gmra.mrb[12].mxu1 %v374_v37  ;;  %v651_v37 = vld [vmem:[%s2118_s4 + $0x88] sm:$0xff] }
 0x128   :  { %1458 = vmatprep.mubr.f32.mxu1 %v375_v38 }
 0x12b   :  { %1459 = vmatmul.mubr.f32.gmra.mrb[14].mxu1 %v376_v39 }
 0x12c   :  { %1461 = vmatprep.mubr.f32.mxu1 %v377_v40 }
 0x12f   :  { %1462 = vmatmul.mubr.f32.gmra.mrb[16].mxu1 %v378_v41  ;;  %v648_v41 = vld [vmem:[%s2118_s4 + $0x70] sm:$0xff] }
 0x130   :  { %1464 = vmatprep.mubr.f32.mxu1 %v379_v42  ;;  %v650_v42 = vld [vmem:[%s2118_s4 + $0x80] sm:$0xff] }
 0x133   :  { %1465 = vmatmul.mubr.f32.gmra.mrb[18].mxu1 %v380_v43 }
 0x134   :  { %1467 = vmatprep.mubr.f32.mxu1 %v381_v44 }
 0x137   :  { %1468 = vmatmul.mubr.f32.gmra.mrb[20].mxu1 %v382_v45 }
 0x138   :  { %1470 = vmatprep.mubr.f32.mxu1 %v383_v46 }
 0x13b   :  { %1471 = vmatmul.mubr.f32.gmra.mrb[22].mxu1 %v384_v47 }
 0x13c   :  { %1473 = vmatprep.mubr.f32.mxu1 %v385_v48 }
 0x13f   :  { %1474 = vmatmul.mubr.f32.gmra.mrb[24].mxu1 %v386_v49 }
 0x140   :  { %1476 = vmatprep.mubr.f32.mxu1 %v387_v50 }
 0x143   :  { %1477 = vmatmul.mubr.f32.gmra.mrb[26].mxu1 %v388_v51 }
 0x1e2   :  { %v1439_v54 = vpop.f32.mrb[0].mxu1  ;;  %v1427_v55 = vpop.f32.mrb[16].mxu0 }
 0x1e3   :  { %v495_v56 = vpop.f32.mrb[1].mxu1  ;;  %v455_v57 = vpop.f32.mrb[17].mxu0  ;;  %v671_v1 = vmul.f32 %v1427_v55, %v635_v58  ;;  %v679_v15 = vmul.f32 %v1439_v54, %v643_v3 }
 0x1e4   :  { %v670_v4 = vmul.f32 %v634_v61, %v455_v57  ;;  %v678_v20 = vmul.f32 %v642_v8, %v495_v56  ;;  %v653_v56 = vld [vmem:[%s2118_s4 + $0x98] sm:$0xff] }
 0x1e6   :  { %v1442_v59 = vpop.f32.mrb[2].mxu1  ;;  %v1430_v60 = vpop.f32.mrb[18].mxu0 }
 0x1e7   :  { %v505_v62 = vpop.f32.mrb[3].mxu1  ;;  %v465_v63 = vpop.f32.mrb[19].mxu0  ;;  %v673_v16 = vmul.f32 %v1430_v60, %v637_v5  ;;  %v681_v38 = vmul.f32 %v1442_v59, %v645_v21  ;;  %v652_v59 = vld [vmem:[%s2118_s4 + $0x90] sm:$0xff] }
 0x1e8   :  { %v672_v22 = vmul.f32 %v636_v9, %v465_v63  ;;  %v680_v43 = vmul.f32 %v644_v27, %v505_v62 }
 0x1ea   :  { %v1433_v6 = vpop.f32.mrb[20].mxu0  ;;  %v1445_v7 = vpop.f32.mrb[4].mxu1 }
 0x1eb   :  { %v675_v10 = vmul.f32 %v1433_v6, %v639_v0  ;;  %v475_v11 = vpop.f32.mrb[21].mxu0  ;;  %v515_v24 = vpop.f32.mrb[5].mxu1  ;;  %v683_v28 = vmul.f32 %v1445_v7, %v647_v12 }
 0x1ec   :  { %v674_v13 = vmul.f32 %v638_v2, %v475_v11  ;;  %v682_v33 = vmul.f32 %v646_v18, %v515_v24  ;;  %v655_v2 = vld [vmem:[%s2118_s4 + $0xa8] sm:$0xff]  ;;  %v656_v24 = vld [vmem:[%s2118_s4 + $0xb0] sm:$0xff] }
 0x1ed   :  { %v707_v17 = vadd.f32 %v675_v10, %v671_v1  ;;  %v657_v10 = vld [vmem:[%s2118_s4 + $0xb8] sm:$0xff] }
 0x1ee   :  { %v706_v23 = vadd.f32 %v674_v13, %v670_v4  ;;  %v1436_v25 = vpop.f32.mrb[22].mxu0  ;;  %v1448_v26 = vpop.f32.mrb[6].mxu1  ;;  %v654_v4 = vld [vmem:[%s2118_s4 + $0xa0] sm:$0xff] }
 0x1ef   :  { %v711_v29 = vadd.f32 %v707_v17, %v679_v15  ;;  %v677_v30 = vmul.f32 %v1436_v25, %v641_v14  ;;  %v485_v31 = vpop.f32.mrb[23].mxu0  ;;  %v525_v32 = vpop.f32.mrb[7].mxu1  ;;  %v685_v47 = vmul.f32 %v1448_v26, %v649_v35  ;;  %v659_v17 = vld [vmem:[%s2118_s4 + $0xc8] sm:$0xff]  ;;  %v661_v26 = vld [vmem:[%s2118_s4 + $0xd8] sm:$0xff] }
 0x1f0   :  { %v710_v34 = vadd.f32 %v706_v23, %v678_v20  ;;  %v676_v36 = vmul.f32 %v640_v19, %v485_v31  ;;  %v684_v51 = vmul.f32 %v648_v41, %v525_v32  ;;  %v658_v19 = vld [vmem:[%s2118_s4 + $0xc0] sm:$0xff] }
 0x1f1   :  { %v715_v39 = vadd.f32 %v711_v29, %v683_v28  ;;  %v709_v40 = vadd.f32 %v677_v30, %v673_v16  ;;  %v660_v28 = vld [vmem:[%s2118_s4 + $0xd0] sm:$0xff] }
 0x1f2   :  { %v714_v44 = vadd.f32 %v710_v34, %v682_v33  ;;  %v708_v45 = vadd.f32 %v676_v36, %v672_v22  ;;  %v1451_v46 = vpop.f32.mrb[8].mxu1  ;;  %v663_v34 = vld [vmem:[%s2118_s4 + $0xe8] sm:$0xff]  ;;  %v662_v36 = vld [vmem:[%s2118_s4 + $0xe0] sm:$0xff] }
 0x1f3   :  { %v713_v48 = vadd.f32 %v709_v40, %v681_v38  ;;  %v687_v49 = vmul.f32 %v1451_v46, %v651_v37  ;;  %v535_v50 = vpop.f32.mrb[9].mxu1 }
 0x1f4   :  { %v712_v54 = vadd.f32 %v708_v45, %v680_v43  ;;  %v686_v55 = vmul.f32 %v650_v42, %v535_v50  ;;  %v665_v42 = vld [vmem:[%s2118_s4 + $0xf8] sm:$0xff]  ;;  %v667_v50 = vld [vmem:[%s2118_s4 + $0x108] sm:$0xff] }
 0x1f5   :  { %v717_v57 = vadd.f32 %v713_v48, %v685_v47  ;;  %v719_v58 = vadd.f32 %v715_v39, %v687_v49 }
 0x1f6   :  { %v716_v60 = vadd.f32 %v712_v54, %v684_v51  ;;  %v718_v61 = vadd.f32 %v714_v44, %v686_v55  ;;  %v1454_v62 = vpop.f32.mrb[10].mxu1  ;;  %v664_v44 = vld [vmem:[%s2118_s4 + $0xf0] sm:$0xff]  ;;  %v666_v54 = vld [vmem:[%s2118_s4 + $0x100] sm:$0xff] }
 0x1f7   :  { %v689_v63 = vmul.f32 %v1454_v62, %v653_v56  ;;  %v545_v0 = vpop.f32.mrb[11].mxu1 }
 0x1f8   :  { %v688_v1 = vmul.f32 %v652_v59, %v545_v0  ;;  %v1252_v59 = vld [vmem:[%s2119_s5] ss:$0 sm:$0xff] }
 0x1f9   :  { %v721_v3 = vadd.f32 %v717_v57, %v689_v63  ;;  %v668_v63 = vld [vmem:[%s2118_s4 + $0x110] sm:$0xff] }
 0x1fa   :  { %v720_v5 = vadd.f32 %v716_v60, %v688_v1  ;;  %v1457_v6 = vpop.f32.mrb[12].mxu1 }
 0x1fb   :  { %v691_v7 = vmul.f32 %v1457_v6, %v655_v2  ;;  %v555_v8 = vpop.f32.mrb[13].mxu1 }
 0x1fc   :  { %v690_v9 = vmul.f32 %v654_v4, %v555_v8 }
 0x1fd   :  { %v723_v11 = vadd.f32 %v719_v58, %v691_v7 }
 0x1fe   :  { %v722_v12 = vadd.f32 %v718_v61, %v690_v9  ;;  %v1460_v13 = vpop.f32.mrb[14].mxu1  ;;  %v669_v61 = vld [vmem:[%s2118_s4 + $0x118] sm:$0xff] }
 0x1ff   :  { %v693_v14 = vmul.f32 %v1460_v13, %v657_v10  ;;  %v565_v15 = vpop.f32.mrb[15].mxu1 }
 0x200   :  { %v692_v16 = vmul.f32 %v656_v24, %v565_v15  ;;  %v828_v15 = vld [vmem:[%s2122_s8] sm:$0xff] }
 0x201   :  { %v725_v18 = vadd.f32 %v721_v3, %v693_v14 }
 0x202   :  { %v724_v20 = vadd.f32 %v720_v5, %v692_v16  ;;  %v1463_v21 = vpop.f32.mrb[16].mxu1  ;;  %v829_v16 = vld [vmem:[%s2122_s8 + $0x8] sm:$0xff] }
 0x203   :  { %v695_v22 = vmul.f32 %v1463_v21, %v659_v17  ;;  %v575_v23 = vpop.f32.mrb[17].mxu1 }
 0x204   :  { %v694_v25 = vmul.f32 %v658_v19, %v575_v23  ;;  %v1569_v19 = vpack.c.bf16 %v829_v16, %v828_v15 }
 0x205   :  { %v727_v27 = vadd.f32 %v723_v11, %v695_v22  ;;  %v912_v22 = vld [vmem:[%s2124_s10] sm:$0xff] }
 0x206   :  { %v726_v29 = vadd.f32 %v722_v12, %v694_v25  ;;  %v1466_v30 = vpop.f32.mrb[18].mxu1 }
 0x207   :  { %v697_v31 = vmul.f32 %v1466_v30, %v661_v26  ;;  %v585_v32 = vpop.f32.mrb[19].mxu1 }
 0x208   :  { %v696_v33 = vmul.f32 %v660_v28, %v585_v32  ;;  %v998_v28 = vld [vmem:[%s2121_s7] sm:$0xff] }
 0x209   :  { %v729_v35 = vadd.f32 %v725_v18, %v697_v31  ;;  %v753_v18 = vld [vmem:[%s2120_s6] sm:$0x3] }
 0x20a   :  { %v728_v37 = vadd.f32 %v724_v20, %v696_v33  ;;  %v1469_v38 = vpop.f32.mrb[20].mxu1 }
 0x20b   :  { %v699_v39 = vmul.f32 %v1469_v38, %v663_v34  ;;  %v595_v40 = vpop.f32.mrb[21].mxu1  ;;  %v1001_v38 = vld [vmem:[%s2121_s7 + $0x18] sm:$0xff] }
 0x20c   :  { %v698_v41 = vmul.f32 %v662_v36, %v595_v40  ;;  %v999_v36 = vld [vmem:[%s2121_s7 + $0x8] sm:$0xff] }
 0x20d   :  { %v731_v43 = vadd.f32 %v727_v27, %v699_v39  ;;  %v1108_v39 = vld [vmem:[%s2126_s12] sm:$0xff]  ;;  %v1109_v40 = vld [vmem:[%s2126_s12 + $0x8] sm:$0xff] }
 0x20e   :  { %v730_v45 = vadd.f32 %v726_v29, %v698_v41  ;;  %v1472_v46 = vpop.f32.mrb[22].mxu1  ;;  %v1571_v41 = vpack.c.bf16 %v1109_v40, %v1108_v39 }
 0x20f   :  { %v701_v47 = vmul.f32 %v1472_v46, %v665_v42  ;;  %v605_v48 = vpop.f32.mrb[23].mxu1 }
 0x210   :  { %v700_v49 = vmul.f32 %v664_v44, %v605_v48 }
 0x211   :  { %v733_v51 = vadd.f32 %v729_v35, %v701_v47 }
 0x212   :  { %v732_v55 = vadd.f32 %v728_v37, %v700_v49  ;;  %v1475_v56 = vpop.f32.mrb[24].mxu1  ;;  %v1000_v37 = vld [vmem:[%s2121_s7 + $0x10] sm:$0xff] }
 0x213   :  { %v703_v57 = vmul.f32 %v1475_v56, %v667_v50  ;;  %v615_v58 = vpop.f32.mrb[25].mxu1  ;;  %v1263_v50 = vld [vmem:[%s2127_s13] ss:$0 sm:$0xff]  ;;  %s1598_s13 = scalar_lea.vmem %s1224_s1, 512 }
 0x214   :  { %v702_v60 = vmul.f32 %v666_v54, %v615_v58  ;;  %p1599_p0 = scmp.ne.s32.totalorder %s1224_s1, %s1598_s13  ;;  %p1604_p2 = scmp.lt.s32.totalorder %s1598_s13, %s1598_s13 }
 0x215   :  { %v735_v62 = vadd.f32 %v731_v43, %v703_v57 }
 0x216   :  { %v734_v0 = vadd.f32 %v730_v45, %v702_v60  ;;  %v1478_v1 = vpop.f32.mrb[26].mxu1  ;;  %p1605_p3 = por %p1604_p2, %p1603_p1 }
 0x217   :  { %v2023_v2 = vadd.f32 %v1252_v59, %v735_v62  ;;  %v705_v3 = vmul.f32 %v1478_v1, %v669_v61  ;;  %v625_v4 = vpop.f32.mrb[27].mxu1 }
 0x218   :  { %v2025_v5 = vadd.f32 %v1252_v59, %v734_v0  ;;  %v704_v6 = vmul.f32 %v668_v63, %v625_v4  ;;  %p1606_p4 = pnand %p1605_p3, %p1599_p0 }
 0x219   :  { %v750_v7 = vmax.f32 %v2023_v2, 0.0  ;;  %v737_v8 = vadd.f32 %v733_v51, %v705_v3 }
 0x21a   :  { %v749_v9 = vmax.f32 %v2025_v5, 0.0  ;;  %v736_v10 = vadd.f32 %v732_v55, %v704_v6 }
 0x21b   :  { %v2029_v11 = vadd.f32 %v1252_v59, %v737_v8 }
 0x21c   :  { %v1563_v24 = vpack.c.bf16 %v750_v7, %v749_v9  ;;  %v2033_v12 = vadd.f32 %v1252_v59, %v736_v10 }
 0x21d   :  { %v752_v13 = vmax.f32 %v2029_v11, 0.0 }
 0x21e   :  { %v751_v14 = vmax.f32 %v2033_v12, 0.0  ;;  %1564 = vmatpush3.bf16.msra.mxu0 %v1563_v24 }
 0x21f   :  { %1565 = vmatprep.subr.bf16.mxu0 %v1623_v52 }
 0x220   :  { %v1566_v17 = vpack.c.bf16 %v752_v13, %v751_v14 }
 0x222   :  { %1567 = vmatpush3.bf16.msra.mxu0 %v1566_v17 }
 0x223   :  { %1568 = vmatprep.subr.bf16.mxu0 %v1623_v52  ;;  %v1254_v52 = vld [vmem:[%s2123_s9] ss:$0 sm:$0xff] }
 0x225   :  { %1488 = vmatmul.mubr.msk.f32.vlgmr.msra.gmra.mrb[24].mxu0 %vm754_vm5, %v753_v18 }
 0x226   :  { %1570 = vmatpush3.bf16.msra.mxu0 %v1569_v19  ;;  %1494 = vmatprep.mubr.msk.f32.mxu0 %vm1624_vm4, %v1625_v53 }
 0x227   :  { %1497 = vmatprep.subr.mxu0 %v1625_v53 }
 0x2f8   :  { %v824_v20 = vpop.f32.mrb[24].mxu0 }
 0x2f9   :  { %1495 = vmatmul.mubr.msk.f32.vlgmr.msra.gmra.mrb[26].mxu0 %vm837_vm6, %v824_v20  ;;  %v1489_v21 = vpop.f32.mrb[25].mxu0 }
 0x2fa   :  { %1499 = vmatprep.mubr.msk.f32.mxu0 %vm1624_vm4, %v1625_v53  ;;  %1498 = vmatpush3.msra.mxu0 %v912_v22  ;;  %v1256_v53 = vld [vmem:[%s2125_s11] ss:$0 sm:$0xff] }
 0x3cc   :  { %v907_v23 = vpop.f32.mrb[26].mxu0 }
 0x3cd   :  { %v908_v25 = vadd.f32 %v1254_v52, %v907_v23  ;;  %v1496_v26 = vpop.f32.mrb[27].mxu0 }
 0x3cf   :  { %v911_v27 = vmax.f32 %v908_v25, 0.0 }
 0x3d1   :  { %1500 = vmatmul.mubr.msk.f32.vlgmr.msra.gmra.mrb[28].mxu0 %vm920_vm7, %v911_v27 }
 0x3d2   :  { %1504 = vmatprep.mubr.msk.f32.mxu0 %vm1002_vm8, %v998_v28 }
 0x4a4   :  { %v990_v29 = vpop.f32.mrb[28].mxu0 }
 0x4a5   :  { %v991_v30 = vadd.f32 %v1256_v53, %v990_v29  ;;  %v1501_v31 = vpop.f32.mrb[29].mxu0 }
 0x4a7   :  { %v994_v32 = vadd.f32 3.0, %v991_v30 }
 0x4a9   :  { %v995_v33 = vmax.f32 %v994_v32, 0.0 }
 0x4ab   :  { %v996_v34 = vmin.f32 %v995_v33, 6.0 }
 0x4ad   :  { %v997_v35 = vmul.f32 0.16666667, %v996_v34 }
 0x4af   :  { %1502 = vmatprep.subr.msk.mxu0 %vm1015_vm9, %v997_v35 }
 0x4b0   :  { %1503 = vmatpush3.msk.msra.mxu0 %vm1015_vm9, %v997_v35 }
 0x4b1   :  { %1505 = vmatmul.mubr.msk.f32.vlgmr.msra.gmra.mrb[30].mxu0 %vm1002_vm8, %v999_v36  ;;  %1572 = vmatprep.subr.bf16.mxu0 %v1571_v41 }
 0x4b2   :  { %1507 = vmatprep.mubr.msk.f32.mxu0 %vm1002_vm8, %v1000_v37  ;;  %1574 = vmatpush3.bf16.msra.mxu0 %v1571_v41 }
 0x4b5   :  { %1508 = vmatmul.mubr.msk.f32.gmra.mrb[32].mxu0 %vm1002_vm8, %v1001_v38 }
 0x584   :  { %v1506_v42 = vpop.f32.mrb[30].mxu0 }
 0x585   :  { %v1085_v43 = vpop.f32.mrb[31].mxu0  ;;  %v1105_v45 = vmul.f32 %v1506_v42, %v750_v7 }
 0x586   :  { %v1104_v44 = vmul.f32 %v1085_v43, %v749_v9 }
 0x588   :  { %v1509_v46 = vpop.f32.mrb[32].mxu0  ;;  %1514 = vmatprep.mubr.msk.f32.mxu0 %vm837_vm6, %v1104_v44 }
 0x589   :  { %v1095_v47 = vpop.f32.mrb[33].mxu0  ;;  %1515 = vmatmul.mubr.msk.f32.vlgmr.msra.gmra.mrb[34].mxu0 %vm837_vm6, %v1105_v45  ;;  %v1107_v49 = vmul.f32 %v1509_v46, %v752_v13 }
 0x58a   :  { %v1106_v48 = vmul.f32 %v1095_v47, %v751_v14 }
 0x58c   :  { %1517 = vmatprep.mubr.msk.f32.mxu0 %vm837_vm6, %v1106_v48 }
 0x58d   :  { %1518 = vmatmul.mubr.msk.f32.gmra.mrb[36].mxu0 %vm837_vm6, %v1107_v49 }
 0x65c   :  { %v1516_v51 = vpop.f32.mrb[34].mxu0 }
 0x65d   :  { %v1201_v54 = vadd.f32 %v1516_v51, %v1263_v50  ;;  %v1195_v55 = vpop.f32.mrb[35].mxu0 }
 0x65e   :  { %v1196_v56 = vadd.f32 %v1263_v50, %v1195_v55 }
 0x65f   :  { %1215 = vst.msk [vmem:[#allocation2 + $0x8] sm:$0xff] %vm837_vm6, %v1201_v54 }
 0x660   :  { %1214 = vst.msk [vmem:[#allocation2] sm:$0xff] %vm837_vm6, %v1196_v56  ;;  %v1519_v57 = vpop.f32.mrb[36].mxu0 }
 0x661   :  { %v1211_v58 = vadd.f32 %v1519_v57, %v1263_v50  ;;  %v1205_v59 = vpop.f32.mrb[37].mxu0 }
 0x662   :  { %v1206_v60 = vadd.f32 %v1263_v50, %v1205_v59 }
 0x663   :  { %1217 = vst.msk [vmem:[#allocation2 + $0x18] sm:$0xff] %vm837_vm6, %v1211_v58 }
 0x664   :  { %1216 = vst.msk [vmem:[#allocation2 + $0x10] sm:$0xff] %vm837_vm6, %v1206_v60 }
 0x665   :  { %1609 = shalt.err (!%p1606_p4)
}
 0x666   :  { %s1610_s5 = scalar_lea.hbm %s2128_s14, 512 }
 0x667   :  { %p1611_p5 = scmp.ne.s32.totalorder %s2128_s14, %s1610_s5  ;;  %p1614_p6 = scmp.lt.u32.totalorder %s1610_s5, %s2128_s14 }
 0x669   :  { %p1616_p7 = pnand %p1614_p6, %p1611_p5 }
 0x66b   :  { %1619 = shalt.err (!%p1616_p7)
}
 0x66c   :  { %s1627_s6 = smov 128   ;;  %s1628_s8 = smov 8  }
 0x66d   :  { %1229 = dma.vmem_to_hbm [thread:$0]  %s1224_s1, 512, %s2128_s14, [#allocation3], %s1627_s6, %s1627_s6, %s1628_s8  }
 0x66e   :  { %1620 = dma.done.wait [#allocation3], 512  }
 0x66f   :  { %1621 = vsyncadd [#allocation3], 4294966784 }
 0x670   :  { %1233 = vsyncpa [#allocation3], 1 }

</bundles_post_ra>
